<compile_context>
chip_gen: v7x
topology: tpu7x:2x2x1
jax: 0.10.0
libtpu: 0.0.40
codegen_flags: <defaults>
</compile_context>

<pallas_src>
import functools
import math

import jax
import jax.numpy as jnp
import numpy as np
from jax.experimental import pallas as pl
from jax.experimental.pallas import tpu as pltpu


def _round_up(a: int, b: int) -> int:
    return (a + b - 1) // b * b


# ---------------------------------------------------------------------------
# Glue: 1-D bilinear interpolation matrix matching PyTorch semantics
# ---------------------------------------------------------------------------
def _interp_matrix(in_size: int, out_size: int, align_corners: bool) -> np.ndarray:
    """Dense (out_size, in_size) matrix M so that  y = M @ x  is PyTorch's
    1-D linear interpolation along that axis."""
    dst = np.arange(out_size, dtype=np.float64)
    if align_corners:
        if out_size == 1:
            src = np.zeros((out_size,), dtype=np.float64)
        else:
            src = dst * (in_size - 1) / (out_size - 1)
    else:
        scale = in_size / out_size
        src = (dst + 0.5) * scale - 0.5
        src = np.maximum(src, 0.0)  # PyTorch clamps negative source coords to 0

    i0 = np.floor(src).astype(np.int64)
    i0 = np.clip(i0, 0, in_size - 1)
    i1 = np.minimum(i0 + 1, in_size - 1)
    frac = src - i0

    mat = np.zeros((out_size, in_size), dtype=np.float64)
    rows = np.arange(out_size)
    np.add.at(mat, (rows, i0), 1.0 - frac)
    np.add.at(mat, (rows, i1), frac)
    return mat.astype(np.float32)


# ---------------------------------------------------------------------------
# Pallas kernel: TB images per grid step, separable upsample via two big
# MXU matmuls with the batch folded into the M dimension.
# ---------------------------------------------------------------------------
def _upsample_kernel(x_ref, whT_ref, wwT_ref, o_ref):
    # x_ref:   (TB, H, W)        input block (io dtype: f32 or bf16)
    # whT_ref: (H, H_out)        H-pass weights (io dtype)
    # wwT_ref: (W, W_out)        W-pass weights (io dtype)
    # o_ref:   (TB, H_out, W_out)
    tb, h, w = x_ref.shape
    h_out = whT_ref.shape[1]
    w_out = wwT_ref.shape[1]

    x = x_ref[...]                                        # (TB, H, W), no upcast
    # ---- H-pass: contract H on the MXU with TB*W folded into M ----
    xt = jnp.swapaxes(x, 1, 2)                            # (TB, W, H)  minor-dim transpose
    t = jnp.dot(xt.reshape(tb * w, h), whT_ref[...],
                preferred_element_type=jnp.float32)       # (TB*W, H_out), f32 acc
    # ---- W-pass: contract W on the MXU with TB*H_out folded into M ----
    tt = jnp.swapaxes(t.reshape(tb, w, h_out), 1, 2)      # (TB, H_out, W)
    out = jnp.dot(tt.reshape(tb * h_out, w),
                  wwT_ref[...].astype(jnp.float32),
                  preferred_element_type=jnp.float32)     # (TB*H_out, W_out)
    o_ref[...] = out.reshape(tb, h_out, w_out).astype(o_ref.dtype)


def _choose_block_batch(b: int, h: int, w: int, h_out: int, w_out: int) -> int:
    """Images per grid step, sized against the smallest scoped-VMEM default
    (16 MiB on v5e; v6e/v7x have >= 32 MiB scoped)."""
    def tile_bytes(r, c):  # f32, lane/sublane padded VMEM footprint of one image plane
        return _round_up(max(r, 1), 8) * _round_up(max(c, 1), 128) * 4
    # double-buffered I/O blocks + in-kernel intermediates (coarse upper bound)
    per_image = 4 * tile_bytes(h, w) + 4 * tile_bytes(h_out, w_out)
    budget = 12 * 1024 * 1024
    tb = max(1, budget // per_image)
    tb = int(min(tb, 512, b))
    if tb >= 8:
        tb -= tb % 8          # keep the folded matmul M dims sublane-aligned
    return max(tb, 1)


@functools.partial(
    jax.jit,
    static_argnames=("scale_factor", "mode", "align_corners", "block_batch"),
)
def upsample(x, *, scale_factor=2, mode="bilinear", align_corners=False,
             block_batch=None):
    """Pallas equivalent of F.interpolate(x, scale_factor, mode, align_corners).

    x: (N, C, H, W) float array (NCHW, same as PyTorch).
    """
    if mode != "bilinear":
        # TODO(synk): other F.interpolate modes (nearest, bicubic, trilinear) not implemented.
        raise NotImplementedError("only mode='bilinear' is implemented")

    n, c, h, w = x.shape
    if isinstance(scale_factor, (tuple, list)):
        sf_h, sf_w = scale_factor
    else:
        sf_h = sf_w = scale_factor
    h_out = int(math.floor(h * sf_h))
    w_out = int(math.floor(w * sf_w))

    orig_dtype = x.dtype
    if x.dtype not in (jnp.float32, jnp.bfloat16):
        x = x.astype(jnp.float32)          # exotic float dtypes go through f32
    io_dtype = x.dtype

    # Interpolation weights in the I/O dtype (bf16 stays MXU-native end to end).
    whT = jnp.asarray(_interp_matrix(h, h_out, align_corners).T, dtype=io_dtype)  # (H, H_out)
    wwT = jnp.asarray(_interp_matrix(w, w_out, align_corners).T, dtype=io_dtype)  # (W, W_out)

    b = n * c
    x_flat = x.reshape(b, h, w)

    tb = block_batch if block_batch is not None else _choose_block_batch(b, h, w, h_out, w_out)
    tb = int(max(1, min(tb, b)))
    b_pad = _round_up(b, tb)
    if b_pad != b:
        # Pad the folded batch so the grid tiles it exactly; padded rows are
        # independent of the real ones and sliced off below.
        x_flat = jnp.pad(x_flat, ((0, b_pad - b), (0, 0), (0, 0)))

    itemsize = jnp.dtype(io_dtype).itemsize
    cost = pl.CostEstimate(
        flops=int(2 * b_pad * (w * h * h_out + h_out * w * w_out)),
        transcendentals=0,
        bytes_accessed=int(b_pad * (h * w + h_out * w_out) * itemsize
                           + (h * h_out + w * w_out) * itemsize),
    )

    out_flat = pl.pallas_call(
        _upsample_kernel,
        out_shape=jax.ShapeDtypeStruct((b_pad, h_out, w_out), io_dtype),
        grid_spec=pltpu.PrefetchScalarGridSpec(
            num_scalar_prefetch=0,
            grid=(b_pad // tb,),
            in_specs=[
                pl.BlockSpec((tb, h, w), lambda i: (i, 0, 0)),
                pl.BlockSpec((h, h_out), lambda i: (0, 0)),   # resident weights
                pl.BlockSpec((w, w_out), lambda i: (0, 0)),   # resident weights
            ],
            out_specs=pl.BlockSpec((tb, h_out, w_out), lambda i: (i, 0, 0)),
        ),
        compiler_params=pltpu.CompilerParams(
            dimension_semantics=("parallel",),
        ),
        cost_estimate=cost,
    )(x_flat, whT, wwT)

    out = out_flat[:b].reshape(n, c, h_out, w_out)
    return out.astype(orig_dtype)


# ---------------------------------------------------------------------------
# Pure-JAX reference (same PyTorch-convention matrices) for verification
# ---------------------------------------------------------------------------
def _reference_upsample(x, scale_factor, align_corners):
    n, c, h, w = x.shape
    h_out = int(math.floor(h * scale_factor))
    w_out = int(math.floor(w * scale_factor))
    wh = jnp.asarray(_interp_matrix(h, h_out, align_corners))
    ww = jnp.asarray(_interp_matrix(w, w_out, align_corners))
    return jnp.einsum("oh,nchw,pw->ncop", wh, x.astype(jnp.float32), ww).astype(x.dtype)


if __name__ == "__main__":
    key = jax.random.PRNGKey(0)
    # Module config as typically instantiated: scale_factor=2, bilinear.
    N, C, H, W = 2, 4, 16, 16
    x = jax.random.normal(key, (N, C, H, W), dtype=jnp.float32)

    out = upsample(x, scale_factor=2, mode="bilinear", align_corners=False)
    out = jax.block_until_ready(out)
    ref = _reference_upsample(x, 2, False)
    assert out.shape == (N, C, 32, 32), out.shape
    np.testing.assert_allclose(np.asarray(out), np.asarray(ref), rtol=1e-5, atol=1e-5)

    # align_corners=True path.
    out_ac = jax.block_until_ready(
        upsample(x, scale_factor=2, mode="bilinear", align_corners=True))
    ref_ac = _reference_upsample(x, 2, True)
    np.testing.assert_allclose(np.asarray(out_ac), np.asarray(ref_ac), rtol=1e-5, atol=1e-5)

    # Exercise the padded / multi-step-grid path (B=6 not divisible by block_batch=4).
    x2 = jax.random.normal(jax.random.PRNGKey(1), (2, 3, 16, 16), dtype=jnp.float32)
    out2 = jax.block_until_ready(
        upsample(x2, scale_factor=2, mode="bilinear", align_corners=False, block_batch=4))
    ref2 = _reference_upsample(x2, 2, False)
    np.testing.assert_allclose(np.asarray(out2), np.asarray(ref2), rtol=1e-5, atol=1e-5)

    print("KERNEL_OK")
</pallas_src>

<mosaic_0001>
module attributes {stable_mosaic.version = 11 : i64} {
  func.func @_upsample_kernel(%arg0: i32, %arg1: memref<8x16x16xf32, #tpu.memory_space<vmem>>, %arg2: memref<16x32xf32, #tpu.memory_space<vmem>>, %arg3: memref<16x32xf32, #tpu.memory_space<vmem>>, %arg4: memref<8x32x32xf32, #tpu.memory_space<vmem>>) attributes {dimension_semantics = [#tpu.dimension_semantics<parallel>], iteration_bounds = array<i64: 1>, scalar_prefetch = 0 : i64, scratch_operands = 0 : i64, tpu.core_type = #tpu.core_type<tc>, window_params = [{transform_indices = @transform_0, window_bounds = array<i64: 8, 16, 16>}, {pipeline_mode = #tpu.pipeline_mode<synchronous>, transform_indices = @transform_1, window_bounds = array<i64: 16, 32>}, {pipeline_mode = #tpu.pipeline_mode<synchronous>, transform_indices = @transform_2, window_bounds = array<i64: 16, 32>}, {transform_indices = @transform_3, window_bounds = array<i64: 8, 32, 32>}]} {
    %c0 = arith.constant 0 : index
    %c0_0 = arith.constant 0 : index
    %c0_1 = arith.constant 0 : index
    %0 = vector.load %arg1[%c0, %c0_0, %c0_1] : memref<8x16x16xf32, #tpu.memory_space<vmem>>, vector<8x16x16xf32>
    %1 = tpu.transpose %0, [0, 2, 1] : vector<8x16x16xf32> -> vector<8x16x16xf32>
    %2 = vector.shape_cast %1 : vector<8x16x16xf32> to vector<128x16xf32>
    %c0_2 = arith.constant 0 : index
    %c0_3 = arith.constant 0 : index
    %3 = vector.load %arg2[%c0_2, %c0_3] : memref<16x32xf32, #tpu.memory_space<vmem>>, vector<16x32xf32>
    %cst = arith.constant dense<0.000000e+00> : vector<128x32xf32>
    %4 = tpu.matmul %2, %3, %cst {dimension_numbers = #tpu.dot_dimension_numbers<[1], [0], [0], [1], [0, 0, 1, 1], [], []>} : vector<128x16xf32>, vector<16x32xf32>, vector<128x32xf32> -> vector<128x32xf32>
    %5 = vector.shape_cast %4 : vector<128x32xf32> to vector<8x16x32xf32>
    %6 = tpu.transpose %5, [0, 2, 1] : vector<8x16x32xf32> -> vector<8x32x16xf32>
    %7 = vector.shape_cast %6 : vector<8x32x16xf32> to vector<256x16xf32>
    %c0_4 = arith.constant 0 : index
    %c0_5 = arith.constant 0 : index
    %8 = vector.load %arg3[%c0_4, %c0_5] : memref<16x32xf32, #tpu.memory_space<vmem>>, vector<16x32xf32>
    %cst_6 = arith.constant dense<0.000000e+00> : vector<256x32xf32>
    %9 = tpu.matmul %7, %8, %cst_6 {dimension_numbers = #tpu.dot_dimension_numbers<[1], [0], [0], [1], [0, 0, 1, 1], [], []>} : vector<256x16xf32>, vector<16x32xf32>, vector<256x32xf32> -> vector<256x32xf32>
    %10 = vector.shape_cast %9 : vector<256x32xf32> to vector<8x32x32xf32>
    %c0_7 = arith.constant 0 : index
    %c0_8 = arith.constant 0 : index
    %c0_9 = arith.constant 0 : index
    %11 = vector.load %arg4[%c0_7, %c0_8, %c0_9] : memref<8x32x32xf32, #tpu.memory_space<vmem>>, vector<8x32x32xf32>
    tpu.vector_store %arg4[%c0_7, %c0_8, %c0_9], %10 {strides = array<i32>} : memref<8x32x32xf32, #tpu.memory_space<vmem>>, vector<8x32x32xf32>,
    return
  }
  func.func @transform_0(%arg0: i32) -> (i32, i32, i32) {
    %c0_i32 = arith.constant 0 : i32
    %c0_i32_0 = arith.constant 0 : i32
    %c0_i32_1 = arith.constant 0 : i32
    return %arg0, %c0_i32, %c0_i32_0 : i32, i32, i32
  }
  func.func @transform_1(%arg0: i32) -> (i32, i32) {
    %c0_i32 = arith.constant 0 : i32
    %c0_i32_0 = arith.constant 0 : i32
    %c0_i32_1 = arith.constant 0 : i32
    return %c0_i32, %c0_i32_0 : i32, i32
  }
  func.func @transform_2(%arg0: i32) -> (i32, i32) {
    %c0_i32 = arith.constant 0 : i32
    %c0_i32_0 = arith.constant 0 : i32
    %c0_i32_1 = arith.constant 0 : i32
    return %c0_i32, %c0_i32_0 : i32, i32
  }
  func.func @transform_3(%arg0: i32) -> (i32, i32, i32) {
    %c0_i32 = arith.constant 0 : i32
    %c0_i32_0 = arith.constant 0 : i32
    %c0_i32_1 = arith.constant 0 : i32
    return %arg0, %c0_i32, %c0_i32_0 : i32, i32, i32
  }
}

</mosaic_0001>

<bundles_post_ra>
// kernel: upsample.1
= control target key start
LH: loop header
LB: loop body
LE: loop exit
PB: predicated region body
PF: predicated region fallthrough
CT: control target
= control target key end

     0   :  { %8 = vsyncpa [#allocation3], 0  ;;  %s1618_s0 = inlined_call_operand.hbm [shape: f32[8,16,16], index: 0, kind: input, shape index: {}]   ;;  %s1619_s1 = inlined_call_operand.hbm [shape: f32[16,32], index: 1, kind: input, shape index: {}, may-alias: {1,2}]   ;;  %s1620_s2 = inlined_call_operand.hbm [shape: f32[16,32], index: 2, kind: input, shape index: {}, may-alias: {1,2}]   ;;  %s1621_s3 = inlined_call_operand.hbm [shape: f32[8,32,32], index: 3, kind: output, shape index: {}]  }
   0x1   :  { %9 = vsyncpa [#allocation6], 0 }
   0x2   :  { %10 = vsyncpa [#allocation4], 0  ;;  %s1445_s12 = smov [#allocation5]   ;;  %s1446_s14 = smov [#allocation2]  }
   0x3   :  { %s28_s13 = sshll.u32 %s1445_s12, 4  ;;  %s16_s15 = sshll.u32 %s1446_s14, 4  ;;  %s29_s13 = int_to_ptr.vmem [resolvable:$true] %s28_s13  ;;  %s1471_s15 = int_to_ptr.vmem [resolvable:$true] %s16_s15 }
   0x4   :  { %s1351_s18 = scalar_lea.hbm %s1619_s1, 256 }
   0x5   :  { %p1352_p0 = scmp.ne.s32.totalorder %s1619_s1, %s1351_s18  ;;  %p1355_p1 = scmp.lt.u32.totalorder %s1351_s18, %s1619_s1 }
   0x7   :  { %p1357_p2 = pnand %p1355_p1, %p1352_p0 }
   0x9   :  { %1360 = shalt.err (!%p1357_p2)
}
   0xa   :  { %s1361_s23 = scalar_lea.vmem %s29_s13, 256  ;;  %p1366_p4 = scmp.lt.s32.totalorder %s29_s13, %s29_s13 }
   0xb   :  { %p1362_p3 = scmp.ne.s32.totalorder %s29_s13, %s1361_s23  ;;  %p1367_p5 = scmp.lt.s32.totalorder %s1361_s23, %s1361_s23 }
   0xd   :  { %p1368_p6 = por %p1367_p5, %p1366_p4 }
   0xf   :  { %p1369_p7 = pnand %p1368_p6, %p1362_p3 }
  0x11   :  { %1372 = shalt.err (!%p1369_p7)
}
  0x12   :  { %s1447_s24 = smov 128   ;;  %s1448_s25 = smov 8  }
  0x13   :  { %34 = dma.hbm_to_vmem [thread:$0]  %s1619_s1, 256, %s29_s13, [#allocation6], %s1447_s24, %s1447_s24, %s1448_s25  }
  0x14   :  { %s1373_s30 = scalar_lea.hbm %s1618_s0, 2048 }
  0x15   :  { %p1374_p8 = scmp.ne.s32.totalorder %s1618_s0, %s1373_s30  ;;  %p1377_p9 = scmp.lt.u32.totalorder %s1373_s30, %s1618_s0 }
  0x17   :  { %p1379_p10 = pnand %p1377_p9, %p1374_p8 }
  0x19   :  { %1382 = shalt.err (!%p1379_p10)
}
  0x1a   :  { %s1383_s8 = scalar_lea.vmem %s1471_s15, 2048  ;;  %p1388_p12 = scmp.lt.s32.totalorder %s1471_s15, %s1471_s15 }
  0x1b   :  { %p1384_p11 = scmp.ne.s32.totalorder %s1471_s15, %s1383_s8  ;;  %p1389_p13 = scmp.lt.s32.totalorder %s1383_s8, %s1383_s8 }
  0x1d   :  { %p1390_p0 = por %p1389_p13, %p1388_p12 }
  0x1f   :  { %p1391_p1 = pnand %p1390_p0, %p1384_p11 }
  0x21   :  { %1394 = shalt.err (!%p1391_p1)
}
  0x22   :  { %22 = dma.hbm_to_vmem [thread:$0]  %s1618_s0, 2048, %s1471_s15, [#allocation3], %s1447_s24, %s1447_s24, %s1448_s25  }
  0x23   :  { %s1449_s10 = smov [#allocation7]   ;;  %s1395_s14 = scalar_lea.hbm %s1620_s2, 256 }
  0x24   :  { %s40_s11 = sshll.u32 %s1449_s10, 4  ;;  %p1396_p2 = scmp.ne.s32.totalorder %s1620_s2, %s1395_s14  ;;  %s41_s11 = int_to_ptr.vmem [resolvable:$true] %s40_s11 }
  0x25   :  { %p1399_p3 = scmp.lt.u32.totalorder %s1395_s14, %s1620_s2 }
  0x27   :  { %p1401_p4 = pnand %p1399_p3, %p1396_p2 }
  0x29   :  { %1404 = shalt.err (!%p1401_p4)
}
  0x2a   :  { %s1405_s20 = scalar_lea.vmem %s41_s11, 256  ;;  %p1410_p6 = scmp.lt.s32.totalorder %s41_s11, %s41_s11 }
  0x2b   :  { %p1406_p5 = scmp.ne.s32.totalorder %s41_s11, %s1405_s20  ;;  %p1411_p7 = scmp.lt.s32.totalorder %s1405_s20, %s1405_s20 }
  0x2d   :  { %p1412_p8 = por %p1411_p7, %p1410_p6 }
  0x2f   :  { %p1413_p9 = pnand %p1412_p8, %p1406_p5 }
  0x31   :  { %1416 = shalt.err (!%p1413_p9)
}
  0x32   :  { %46 = dma.hbm_to_vmem [thread:$0]  %s1620_s2, 256, %s41_s11, [#allocation6], %s1447_s24, %s1447_s24, %s1448_s25  }
  0x33   :  { %1439 = dma.done.wait [#allocation3], 2048  }
  0x34   :  { %1440 = vsyncadd [#allocation3], 4294965248 }
  0x35   :  { %1441 = dma.done.wait [#allocation6], 512  }
  0x36   :  { %1442 = vsyncadd [#allocation6], 4294966784  ;;  %v56_v0 = vld [vmem:[#allocation2] sm:$0xff]  ;;  %v58_v1 = vld [vmem:[#allocation2 + $0x10] sm:$0xff]  ;;  %vm330_vm0 = vcmask 130048   ;;  %vm1103_vm1 = vcmask 261120  }
  0x37   :  { %72 = vxpose.xlu0.b32.start [1/2] (short) (narrow) %v56_v0, 16  ;;  %104 = vxpose.xlu1.b32.start [1/2] (short) (narrow) %v58_v1, 16  ;;  %v57_v2 = vld [vmem:[#allocation2 + $0x8] sm:$0xff]  ;;  %v59_v3 = vld [vmem:[#allocation2 + $0x18] sm:$0xff]  ;;  %v328_v4 = vld [vmem:[#allocation5] sm:$0xff]  ;;  %s1450_s2 = smov [#allocation8]  }
  0x38   :  { %v329_v5 = vld [vmem:[#allocation5 + $0x8] sm:$0xff]  ;;  %v60_v6 = vld [vmem:[#allocation2 + $0x20] sm:$0xff]  ;;  %v62_v7 = vld [vmem:[#allocation2 + $0x30] sm:$0xff]  ;;  %s1141_s21 = sshll.u32 %s1450_s2, 4  ;;  %s1142_s21 = int_to_ptr.vmem [resolvable:$true] %s1141_s21 }
  0x39   :  { %v1334_v8 = vpack.c.bf16 %v329_v5, %v328_v4  ;;  %v61_v9 = vld [vmem:[#allocation2 + $0x28] sm:$0xff]  ;;  %v63_v10 = vld [vmem:[#allocation2 + $0x38] sm:$0xff]  ;;  %v64_v11 = vld [vmem:[#allocation2 + $0x40] sm:$0xff]  ;;  %s1417_s22 = scalar_lea.vmem %s1142_s21, 4096  ;;  %p1422_p11 = scmp.lt.s32.totalorder %s1142_s21, %s1142_s21 }
  0x3a   :  { %v66_v12 = vld [vmem:[#allocation2 + $0x50] sm:$0xff]  ;;  %v65_v13 = vld [vmem:[#allocation2 + $0x48] sm:$0xff]  ;;  %v67_v14 = vld [vmem:[#allocation2 + $0x58] sm:$0xff]  ;;  %p1418_p10 = scmp.ne.s32.totalorder %s1142_s21, %s1417_s22  ;;  %p1423_p12 = scmp.lt.s32.totalorder %s1417_s22, %s1417_s22 }
  0x3b   :  { %73 = vxpose.xlu0.b32.end [2/2] (short) (narrow) %v57_v2, 16  ;;  %105 = vxpose.xlu1.b32.end [2/2] (short) (narrow) %v59_v3, 16  ;;  %v68_v15 = vld [vmem:[#allocation2 + $0x60] sm:$0xff]  ;;  %v70_v16 = vld [vmem:[#allocation2 + $0x70] sm:$0xff]  ;;  %v69_v17 = vld [vmem:[#allocation2 + $0x68] sm:$0xff] }
  0x3c   :  { %1335 = vmatprep.subr.bf16.mxu0 %v1334_v8  ;;  %v71_v18 = vld [vmem:[#allocation2 + $0x78] sm:$0xff]  ;;  %v780_v41 = vld [vmem:[#allocation7] sm:$0xff]  ;;  %p1424_p13 = por %p1423_p12, %p1422_p11 }
  0x3d   :  { %1337 = vmatpush3.bf16.msra.mxu0 %v1334_v8  ;;  %v781_v42 = vld [vmem:[#allocation7 + $0x8] sm:$0xff] }
  0x3e   :  { %v1338_v43 = vpack.c.bf16 %v781_v42, %v780_v41  ;;  %p1425_p0 = pnand %p1424_p13, %p1418_p10 }
  0x3f   :  { %136 = vxpose.xlu0.b32.start [1/2] (short) (narrow) %v60_v6, 16  ;;  %168 = vxpose.xlu1.b32.start [1/2] (short) (narrow) %v62_v7, 16 }
  0x40   :  { %1342 = vmatprep.subr.bf16.mxu1 %v1338_v43  ;;  %1339 = vmatprep.subr.bf16.mxu0 %v1338_v43 }
  0x41   :  { %1343 = vmatpush3.bf16.msra.mxu1 %v1338_v43 }
  0x43   :  { %137 = vxpose.xlu0.b32.end [2/2] (short) (narrow) %v61_v9, 16  ;;  %169 = vxpose.xlu1.b32.end [2/2] (short) (narrow) %v63_v10, 16 }
  0x47   :  { %200 = vxpose.xlu0.b32.start [1/2] (short) (narrow) %v64_v11, 16  ;;  %232 = vxpose.xlu1.b32.start [1/2] (short) (narrow) %v66_v12, 16 }
  0x4b   :  { %201 = vxpose.xlu0.b32.end [2/2] (short) (narrow) %v65_v13, 16  ;;  %233 = vxpose.xlu1.b32.end [2/2] (short) (narrow) %v67_v14, 16 }
  0x4f   :  { %264 = vxpose.xlu0.b32.start [1/2] (short) (narrow) %v68_v15, 16  ;;  %296 = vxpose.xlu1.b32.start [1/2] (short) (narrow) %v70_v16, 16 }
  0x53   :  { %265 = vxpose.xlu0.b32.end [2/2] (short) (narrow) %v69_v17, 16  ;;  %297 = vxpose.xlu1.b32.end [2/2] (short) (narrow) %v71_v18, 16 }
  0xb7   :  { %v88_v19 = vpop.trf.xlu0  ;;  %v120_v20 = vpop.trf.xlu1 }
  0xb8   :  { %1258 = vmatprep.mubr.msk.f32.mxu0 %vm330_vm0, %v88_v19 }
  0xbb   :  { %v89_v21 = vpop.trf.xlu0  ;;  %v121_v22 = vpop.trf.xlu1 }
  0xbc   :  { %1259 = vmatmul.mubr.msk.f32.vlgmr.msra.gmra.mrb[0].mxu0 %vm330_vm0, %v89_v21 }
  0xbd   :  { %1261 = vmatprep.mubr.msk.f32.mxu0 %vm330_vm0, %v120_v20  ;;  %1341 = vmatpush3.bf16.msra.mxu0 %v1338_v43 }
  0xbf   :  { %v152_v23 = vpop.trf.xlu0  ;;  %v184_v24 = vpop.trf.xlu1 }
  0xc0   :  { %1262 = vmatmul.mubr.msk.f32.gmra.mrb[2].mxu0 %vm330_vm0, %v121_v22 }
  0xc1   :  { %1264 = vmatprep.mubr.msk.f32.mxu0 %vm330_vm0, %v152_v23 }
  0xc3   :  { %v153_v25 = vpop.trf.xlu0  ;;  %v185_v26 = vpop.trf.xlu1 }
  0xc4   :  { %1265 = vmatmul.mubr.msk.f32.gmra.mrb[4].mxu0 %vm330_vm0, %v153_v25 }
  0xc5   :  { %1267 = vmatprep.mubr.msk.f32.mxu0 %vm330_vm0, %v184_v24 }
  0xc7   :  { %v216_v27 = vpop.trf.xlu0  ;;  %v248_v28 = vpop.trf.xlu1 }
  0xc8   :  { %1268 = vmatmul.mubr.msk.f32.gmra.mrb[6].mxu0 %vm330_vm0, %v185_v26 }
  0xc9   :  { %1270 = vmatprep.mubr.msk.f32.mxu0 %vm330_vm0, %v216_v27 }
  0xcb   :  { %v217_v29 = vpop.trf.xlu0  ;;  %v249_v30 = vpop.trf.xlu1 }
  0xcc   :  { %1271 = vmatmul.mubr.msk.f32.gmra.mrb[8].mxu0 %vm330_vm0, %v217_v29 }
  0xcd   :  { %1273 = vmatprep.mubr.msk.f32.mxu0 %vm330_vm0, %v248_v28 }
  0xcf   :  { %v280_v31 = vpop.trf.xlu0  ;;  %v312_v32 = vpop.trf.xlu1 }
  0xd0   :  { %1274 = vmatmul.mubr.msk.f32.gmra.mrb[10].mxu0 %vm330_vm0, %v249_v30 }
  0xd1   :  { %1276 = vmatprep.mubr.msk.f32.mxu0 %vm330_vm0, %v280_v31 }
  0xd3   :  { %v281_v33 = vpop.trf.xlu0  ;;  %v313_v34 = vpop.trf.xlu1 }
  0xd4   :  { %1277 = vmatmul.mubr.msk.f32.gmra.mrb[12].mxu0 %vm330_vm0, %v281_v33 }
  0xd5   :  { %1279 = vmatprep.mubr.msk.f32.mxu0 %vm330_vm0, %v312_v32 }
  0xd8   :  { %1280 = vmatmul.mubr.msk.f32.gmra.mrb[14].mxu0 %vm330_vm0, %v313_v34 }
 0x18f   :  { %v1260_v35 = vpop.f32.mrb[0].mxu0 }
 0x190   :  { %v445_v36 = vpop.f32.mrb[1].mxu0 }
 0x193   :  { %v1263_v37 = vpop.f32.mrb[2].mxu0 }
 0x194   :  { %v455_v38 = vpop.f32.mrb[3].mxu0 }
 0x197   :  { %v1266_v39 = vpop.f32.mrb[4].mxu0 }
 0x198   :  { %v465_v40 = vpop.f32.mrb[5].mxu0 }
 0x199   :  { %588 = vxpose.xlu0.b32.start [1/2] (short) (narrow) %v465_v40, 32 }
 0x19b   :  { %v1269_v44 = vpop.f32.mrb[6].mxu0 }
 0x19c   :  { %v475_v45 = vpop.f32.mrb[7].mxu0 }
 0x19d   :  { %589 = vxpose.xlu0.b32.end [2/2] (short) (narrow) %v1266_v39, 32  ;;  %620 = vxpose.xlu1.b32.start [1/2] (short) (narrow) %v475_v45, 32 }
 0x19f   :  { %v1272_v46 = vpop.f32.mrb[8].mxu0 }
 0x1a0   :  { %v485_v47 = vpop.f32.mrb[9].mxu0 }
 0x1a1   :  { %621 = vxpose.xlu1.b32.end [2/2] (short) (narrow) %v1269_v44, 32 }
 0x1a3   :  { %v1275_v48 = vpop.f32.mrb[10].mxu0 }
 0x1a4   :  { %v495_v49 = vpop.f32.mrb[11].mxu0 }
 0x1a6   :  { %652 = vxpose.xlu0.b32.start [1/2] (short) (narrow) %v485_v47, 32 }
 0x1a7   :  { %v1278_v50 = vpop.f32.mrb[12].mxu0 }
 0x1a8   :  { %v505_v51 = vpop.f32.mrb[13].mxu0 }
 0x1aa   :  { %653 = vxpose.xlu0.b32.end [2/2] (short) (narrow) %v1272_v46, 32  ;;  %684 = vxpose.xlu1.b32.start [1/2] (short) (narrow) %v495_v49, 32 }
 0x1ab   :  { %v1281_v52 = vpop.f32.mrb[14].mxu0 }
 0x1ac   :  { %v515_v53 = vpop.f32.mrb[15].mxu0 }
 0x1ae   :  { %685 = vxpose.xlu1.b32.end [2/2] (short) (narrow) %v1275_v48, 32 }
 0x1b3   :  { %524 = vxpose.xlu0.b32.start [1/2] (short) (narrow) %v445_v36, 32 }
 0x1b7   :  { %525 = vxpose.xlu0.b32.end [2/2] (short) (narrow) %v1260_v35, 32  ;;  %716 = vxpose.xlu1.b32.start [1/2] (short) (narrow) %v505_v51, 32 }
 0x1bb   :  { %717 = vxpose.xlu1.b32.end [2/2] (short) (narrow) %v1278_v50, 32 }
 0x1c0   :  { %556 = vxpose.xlu0.b32.start [1/2] (short) (narrow) %v455_v38, 32 }
 0x1c4   :  { %557 = vxpose.xlu0.b32.end [2/2] (short) (narrow) %v1263_v37, 32  ;;  %748 = vxpose.xlu1.b32.start [1/2] (short) (narrow) %v515_v53, 32 }
 0x1c8   :  { %749 = vxpose.xlu1.b32.end [2/2] (short) (narrow) %v1281_v52, 32 }
 0x219   :  { %v604_v54 = vpop.trf.xlu0 }
 0x21a   :  { %1298 = vmatprep.mubr.msk.f32.mxu1 %vm330_vm0, %v604_v54 }
 0x21d   :  { %v636_v55 = vpop.trf.xlu1  ;;  %v605_v56 = vpop.trf.xlu0 }
 0x21e   :  { %1299 = vmatmul.mubr.msk.f32.vlgmr.msra.gmra.mrb[0].mxu1 %vm330_vm0, %v605_v56 }
 0x221   :  { %v637_v57 = vpop.trf.xlu1  ;;  %v606_v58 = vpop.trf.xlu0 }
 0x222   :  { %1301 = vmatprep.mubr.msk.f32.mxu1 %vm330_vm0, %v606_v58 }
 0x225   :  { %v638_v59 = vpop.trf.xlu1  ;;  %v607_v60 = vpop.trf.xlu0 }
 0x226   :  { %1302 = vmatmul.mubr.msk.f32.gmra.mrb[2].mxu1 %vm330_vm0, %v607_v60 }
 0x227   :  { %1304 = vmatprep.mubr.msk.f32.mxu1 %vm330_vm0, %v636_v55 }
 0x229   :  { %v639_v61 = vpop.trf.xlu1  ;;  %v668_v62 = vpop.trf.xlu0 }
 0x22a   :  { %1305 = vmatmul.mubr.msk.f32.gmra.mrb[4].mxu1 %vm330_vm0, %v637_v57 }
 0x22b   :  { %1307 = vmatprep.mubr.msk.f32.mxu1 %vm330_vm0, %v638_v59 }
 0x22d   :  { %v700_v63 = vpop.trf.xlu1  ;;  %v669_v0 = vpop.trf.xlu0 }
 0x22e   :  { %1308 = vmatmul.mubr.msk.f32.gmra.mrb[6].mxu1 %vm330_vm0, %v639_v61 }
 0x22f   :  { %1310 = vmatprep.mubr.msk.f32.mxu1 %vm330_vm0, %v668_v62 }
 0x231   :  { %v701_v1 = vpop.trf.xlu1  ;;  %v670_v2 = vpop.trf.xlu0 }
 0x232   :  { %1311 = vmatmul.mubr.msk.f32.gmra.mrb[8].mxu1 %vm330_vm0, %v669_v0 }
 0x233   :  { %1313 = vmatprep.mubr.msk.f32.mxu1 %vm330_vm0, %v670_v2 }
 0x235   :  { %v702_v3 = vpop.trf.xlu1  ;;  %v671_v4 = vpop.trf.xlu0 }
 0x236   :  { %1314 = vmatmul.mubr.msk.f32.gmra.mrb[10].mxu1 %vm330_vm0, %v671_v4 }
 0x237   :  { %1316 = vmatprep.mubr.msk.f32.mxu1 %vm330_vm0, %v700_v63 }
 0x239   :  { %v703_v5 = vpop.trf.xlu1  ;;  %v540_v6 = vpop.trf.xlu0 }
 0x23a   :  { %1317 = vmatmul.mubr.msk.f32.gmra.mrb[12].mxu1 %vm330_vm0, %v701_v1  ;;  %1286 = vmatprep.mubr.msk.f32.mxu0 %vm330_vm0, %v540_v6 }
 0x23b   :  { %1319 = vmatprep.mubr.msk.f32.mxu1 %vm330_vm0, %v702_v3 }
 0x23d   :  { %v732_v7 = vpop.trf.xlu1  ;;  %v541_v8 = vpop.trf.xlu0 }
 0x23e   :  { %1320 = vmatmul.mubr.msk.f32.gmra.mrb[14].mxu1 %vm330_vm0, %v703_v5  ;;  %1287 = vmatmul.mubr.msk.f32.vlgmr.msra.gmra.mrb[16].mxu0 %vm330_vm0, %v541_v8 }
 0x23f   :  { %1322 = vmatprep.mubr.msk.f32.mxu1 %vm330_vm0, %v732_v7 }
 0x241   :  { %v733_v9 = vpop.trf.xlu1  ;;  %v542_v10 = vpop.trf.xlu0 }
 0x242   :  { %1323 = vmatmul.mubr.msk.f32.gmra.mrb[16].mxu1 %vm330_vm0, %v733_v9  ;;  %1289 = vmatprep.mubr.msk.f32.mxu0 %vm330_vm0, %v542_v10 }
 0x245   :  { %v734_v11 = vpop.trf.xlu1  ;;  %v543_v12 = vpop.trf.xlu0 }
 0x246   :  { %1325 = vmatprep.mubr.msk.f32.mxu1 %vm330_vm0, %v734_v11  ;;  %1290 = vmatmul.mubr.msk.f32.gmra.mrb[18].mxu0 %vm330_vm0, %v543_v12 }
 0x249   :  { %v735_v13 = vpop.trf.xlu1  ;;  %v572_v14 = vpop.trf.xlu0 }
 0x24a   :  { %1326 = vmatmul.mubr.msk.f32.gmra.mrb[18].mxu1 %vm330_vm0, %v735_v13  ;;  %1292 = vmatprep.mubr.msk.f32.mxu0 %vm330_vm0, %v572_v14 }
 0x24d   :  { %v764_v15 = vpop.trf.xlu1  ;;  %v573_v16 = vpop.trf.xlu0 }
 0x24e   :  { %1328 = vmatprep.mubr.msk.f32.mxu1 %vm330_vm0, %v764_v15  ;;  %1293 = vmatmul.mubr.msk.f32.gmra.mrb[20].mxu0 %vm330_vm0, %v573_v16 }
 0x251   :  { %v765_v17 = vpop.trf.xlu1  ;;  %v574_v18 = vpop.trf.xlu0 }
 0x252   :  { %1329 = vmatmul.mubr.msk.f32.gmra.mrb[20].mxu1 %vm330_vm0, %v765_v17  ;;  %1295 = vmatprep.mubr.msk.f32.mxu0 %vm330_vm0, %v574_v18 }
 0x255   :  { %v766_v19 = vpop.trf.xlu1  ;;  %v575_v20 = vpop.trf.xlu0 }
 0x256   :  { %1331 = vmatprep.mubr.msk.f32.mxu1 %vm330_vm0, %v766_v19  ;;  %1296 = vmatmul.mubr.msk.f32.gmra.mrb[22].mxu0 %vm330_vm0, %v575_v20 }
 0x259   :  { %v767_v21 = vpop.trf.xlu1 }
 0x25a   :  { %1332 = vmatmul.mubr.msk.f32.gmra.mrb[22].mxu1 %vm330_vm0, %v767_v21 }
 0x2f1   :  { %v1300_v22 = vpop.f32.mrb[0].mxu1 }
 0x2f2   :  { %1113 = vst.msk [vmem:[#allocation8 + $0x48] sm:$0xff] %vm1103_vm1, %v1300_v22  ;;  %v984_v23 = vpop.f32.mrb[1].mxu1 }
 0x2f3   :  { %1112 = vst.msk [vmem:[#allocation8 + $0x40] sm:$0xff] %vm1103_vm1, %v984_v23 }
 0x2f9   :  { %v1303_v24 = vpop.f32.mrb[2].mxu1 }
 0x2fa   :  { %1115 = vst.msk [vmem:[#allocation8 + $0x58] sm:$0xff] %vm1103_vm1, %v1303_v24  ;;  %v994_v25 = vpop.f32.mrb[3].mxu1 }
 0x2fb   :  { %1114 = vst.msk [vmem:[#allocation8 + $0x50] sm:$0xff] %vm1103_vm1, %v994_v25 }
 0x2fd   :  { %v1306_v26 = vpop.f32.mrb[4].mxu1 }
 0x2fe   :  { %1117 = vst.msk [vmem:[#allocation8 + $0x68] sm:$0xff] %vm1103_vm1, %v1306_v26  ;;  %v1004_v27 = vpop.f32.mrb[5].mxu1 }
 0x2ff   :  { %1116 = vst.msk [vmem:[#allocation8 + $0x60] sm:$0xff] %vm1103_vm1, %v1004_v27 }
 0x301   :  { %v1309_v28 = vpop.f32.mrb[6].mxu1 }
 0x302   :  { %1119 = vst.msk [vmem:[#allocation8 + $0x78] sm:$0xff] %vm1103_vm1, %v1309_v28  ;;  %v1014_v29 = vpop.f32.mrb[7].mxu1 }
 0x303   :  { %1118 = vst.msk [vmem:[#allocation8 + $0x70] sm:$0xff] %vm1103_vm1, %v1014_v29 }
 0x305   :  { %v1312_v30 = vpop.f32.mrb[8].mxu1 }
 0x306   :  { %1121 = vst.msk [vmem:[#allocation8 + $0x88] sm:$0xff] %vm1103_vm1, %v1312_v30  ;;  %v1024_v31 = vpop.f32.mrb[9].mxu1 }
 0x307   :  { %1120 = vst.msk [vmem:[#allocation8 + $0x80] sm:$0xff] %vm1103_vm1, %v1024_v31 }
 0x309   :  { %v1315_v32 = vpop.f32.mrb[10].mxu1 }
 0x30a   :  { %1123 = vst.msk [vmem:[#allocation8 + $0x98] sm:$0xff] %vm1103_vm1, %v1315_v32  ;;  %v1034_v33 = vpop.f32.mrb[11].mxu1 }
 0x30b   :  { %1122 = vst.msk [vmem:[#allocation8 + $0x90] sm:$0xff] %vm1103_vm1, %v1034_v33 }
 0x30d   :  { %v1318_v34 = vpop.f32.mrb[12].mxu1 }
 0x30e   :  { %1125 = vst.msk [vmem:[#allocation8 + $0xa8] sm:$0xff] %vm1103_vm1, %v1318_v34  ;;  %v1044_v35 = vpop.f32.mrb[13].mxu1 }
 0x30f   :  { %1124 = vst.msk [vmem:[#allocation8 + $0xa0] sm:$0xff] %vm1103_vm1, %v1044_v35 }
 0x311   :  { %v1321_v36 = vpop.f32.mrb[14].mxu1  ;;  %v1288_v37 = vpop.f32.mrb[16].mxu0 }
 0x312   :  { %1127 = vst.msk [vmem:[#allocation8 + $0xb8] sm:$0xff] %vm1103_vm1, %v1321_v36  ;;  %v1054_v38 = vpop.f32.mrb[15].mxu1  ;;  %1105 = vst.msk [vmem:[#allocation8 + $0x8] sm:$0xff] %vm1103_vm1, %v1288_v37  ;;  %v944_v39 = vpop.f32.mrb[17].mxu0 }
 0x313   :  { %1126 = vst.msk [vmem:[#allocation8 + $0xb0] sm:$0xff] %vm1103_vm1, %v1054_v38  ;;  %1104 = vst.msk [vmem:[#allocation8] sm:$0xff] %vm1103_vm1, %v944_v39 }
 0x315   :  { %v1324_v40 = vpop.f32.mrb[16].mxu1 }
 0x316   :  { %1129 = vst.msk [vmem:[#allocation8 + $0xc8] sm:$0xff] %vm1103_vm1, %v1324_v40  ;;  %v1064_v41 = vpop.f32.mrb[17].mxu1 }
 0x317   :  { %1128 = vst.msk [vmem:[#allocation8 + $0xc0] sm:$0xff] %vm1103_vm1, %v1064_v41 }
 0x319   :  { %v1291_v42 = vpop.f32.mrb[18].mxu0 }
 0x31a   :  { %1107 = vst.msk [vmem:[#allocation8 + $0x18] sm:$0xff] %vm1103_vm1, %v1291_v42  ;;  %v954_v43 = vpop.f32.mrb[19].mxu0 }
 0x31b   :  { %1106 = vst.msk [vmem:[#allocation8 + $0x10] sm:$0xff] %vm1103_vm1, %v954_v43 }
 0x31d   :  { %v1327_v44 = vpop.f32.mrb[18].mxu1 }
 0x31e   :  { %1131 = vst.msk [vmem:[#allocation8 + $0xd8] sm:$0xff] %vm1103_vm1, %v1327_v44  ;;  %v1074_v45 = vpop.f32.mrb[19].mxu1 }
 0x31f   :  { %1130 = vst.msk [vmem:[#allocation8 + $0xd0] sm:$0xff] %vm1103_vm1, %v1074_v45 }
 0x321   :  { %v1294_v46 = vpop.f32.mrb[20].mxu0 }
 0x322   :  { %1109 = vst.msk [vmem:[#allocation8 + $0x28] sm:$0xff] %vm1103_vm1, %v1294_v46  ;;  %v964_v47 = vpop.f32.mrb[21].mxu0 }
 0x323   :  { %1108 = vst.msk [vmem:[#allocation8 + $0x20] sm:$0xff] %vm1103_vm1, %v964_v47 }
 0x325   :  { %v1330_v48 = vpop.f32.mrb[20].mxu1 }
 0x326   :  { %1133 = vst.msk [vmem:[#allocation8 + $0xe8] sm:$0xff] %vm1103_vm1, %v1330_v48  ;;  %v1084_v49 = vpop.f32.mrb[21].mxu1 }
 0x327   :  { %1132 = vst.msk [vmem:[#allocation8 + $0xe0] sm:$0xff] %vm1103_vm1, %v1084_v49 }
 0x329   :  { %v1297_v50 = vpop.f32.mrb[22].mxu0 }
 0x32a   :  { %1111 = vst.msk [vmem:[#allocation8 + $0x38] sm:$0xff] %vm1103_vm1, %v1297_v50  ;;  %v974_v51 = vpop.f32.mrb[23].mxu0 }
 0x32b   :  { %1110 = vst.msk [vmem:[#allocation8 + $0x30] sm:$0xff] %vm1103_vm1, %v974_v51 }
 0x32d   :  { %v1333_v52 = vpop.f32.mrb[22].mxu1 }
 0x32e   :  { %1135 = vst.msk [vmem:[#allocation8 + $0xf8] sm:$0xff] %vm1103_vm1, %v1333_v52  ;;  %v1094_v53 = vpop.f32.mrb[23].mxu1 }
 0x32f   :  { %1134 = vst.msk [vmem:[#allocation8 + $0xf0] sm:$0xff] %vm1103_vm1, %v1094_v53 }
 0x330   :  { %1428 = shalt.err (!%p1425_p0)
}
 0x331   :  { %s1429_s27 = scalar_lea.hbm %s1621_s3, 4096 }
 0x332   :  { %p1430_p1 = scmp.ne.s32.totalorder %s1621_s3, %s1429_s27  ;;  %p1433_p2 = scmp.lt.u32.totalorder %s1429_s27, %s1621_s3 }
 0x334   :  { %p1435_p3 = pnand %p1433_p2, %p1430_p1 }
 0x336   :  { %1438 = shalt.err (!%p1435_p3)
}
 0x337   :  { %1147 = dma.vmem_to_hbm [thread:$0]  %s1142_s21, 4096, %s1621_s3, [#allocation4], %s1447_s24, %s1447_s24, %s1448_s25  }
 0x338   :  { %1443 = dma.done.wait [#allocation4], 4096  }
 0x339   :  { %1444 = vsyncadd [#allocation4], 4294963200 }
 0x33a   :  { %1151 = vsyncpa [#allocation3], 1 }
 0x33b   :  { %1152 = vsyncpa [#allocation6], 1 }
 0x33c   :  { %1153 = vsyncpa [#allocation4], 1 }

</bundles_post_ra>
